<compile_context>
chip_gen: v7x
topology: tpu7x:2x2x1
jax: 0.10.0
libtpu: 0.0.40
codegen_flags: <defaults>
</compile_context>

<pallas_src>
import math

import jax
import jax.numpy as jnp
from jax.experimental import pallas as pl
from jax.experimental.pallas import tpu as pltpu


# --------------------------------------------------------------------------
# Kernel
# --------------------------------------------------------------------------
def _copy_kernel(w_ref, o_ref):
    # Forward pass of My_3D_Parameter: return self.weights (tile-wise copy).
    o_ref[...] = w_ref[...]


# --------------------------------------------------------------------------
# Tiling helpers
# --------------------------------------------------------------------------
def _sublane_multiple(dtype) -> int:
    # Packed-sublane multiples: f32 -> 8, bf16 -> 16, int8/fp8 -> 32.
    itemsize = jnp.dtype(dtype).itemsize
    return {4: 8, 2: 16, 1: 32}.get(itemsize, 8)


def _choose_row_tile(size_in: int, size_out: int, dtype,
                     vmem_budget_bytes: int = 16 * 1024 * 1024) -> int:
    """Largest row tile whose double-buffered in+out footprint (~4x tile bytes)
    fits a conservative VMEM budget valid on v5e/v6e *and* v7x (64 MiB phys,
    32 MiB default scoped)."""
    itemsize = jnp.dtype(dtype).itemsize
    sub = _sublane_multiple(dtype)
    lanes = max(size_out, 128)  # padded lane footprint for narrow last dims
    tr = vmem_budget_bytes // (4 * lanes * itemsize)
    tr = max(sub, (tr // sub) * sub)
    if tr >= size_in:
        return size_in  # whole array fits in a single lane-dense block
    return tr


# --------------------------------------------------------------------------
# Forward wrappers
# --------------------------------------------------------------------------
def my_3d_parameter_forward(weights: jax.Array) -> jax.Array:
    """Faithful forward(): the module returns its parameter unchanged.

    A pass-through has zero compute, so the fastest correct implementation is
    to return the array directly (no pallas_call, no HBM round-trip).
    """
    return weights


def my_3d_parameter_forward_materialized(weights: jax.Array,
                                         *,
                                         row_tile: int | None = None,
                                         alias_output_to_input: bool = True) -> jax.Array:
    """Pallas copy kernel, for callers that require a materialized output.

    Row-tiled streaming copy with output aliased to the input HBM buffer.
    The alias is fully realized (no defensive copy) when the caller donates
    `weights`, e.g. jax.jit(fn, donate_argnums=0).
    """
    size_in, size_out = weights.shape
    tr = row_tile if row_tile is not None else _choose_row_tile(
        size_in, size_out, weights.dtype)
    grid = (pl.cdiv(size_in, tr),)

    return pl.pallas_call(
        _copy_kernel,
        out_shape=jax.ShapeDtypeStruct((size_in, size_out), weights.dtype),
        grid_spec=pltpu.PrefetchScalarGridSpec(
            num_scalar_prefetch=0,
            grid=grid,
            # Last block dim is the full size_out -> lane-dense stores when
            # size_out is a multiple of 128 (it is 128 here).
            in_specs=[pl.BlockSpec((tr, size_out), lambda i: (i, 0))],
            out_specs=pl.BlockSpec((tr, size_out), lambda i: (i, 0)),
        ),
        compiler_params=pltpu.CompilerParams(
            # Row tiles are independent -> shard across v7x's 2 TensorCores.
            dimension_semantics=("parallel",),
        ),
        # Reuse the input HBM buffer for the output (no second allocation).
        input_output_aliases={0: 0} if alias_output_to_input else {},
    )(weights)


# --------------------------------------------------------------------------
# Parameter init (deterministic replica of nn.init.kaiming_uniform_(a=sqrt(5)))
# --------------------------------------------------------------------------
def kaiming_uniform_init(key, size_in: int, size_out: int, a: float = math.sqrt(5)):
    """For a 2-D tensor (size_in, size_out), PyTorch fan_in = size_out.
    gain = sqrt(2/(1+a^2)), bound = gain*sqrt(3/fan_in), U(-bound, bound)."""
    fan_in = size_out
    gain = math.sqrt(2.0 / (1.0 + a * a))
    bound = gain * math.sqrt(3.0 / fan_in)
    return jax.random.uniform(
        key, (size_in, size_out), dtype=jnp.float32, minval=-bound, maxval=bound
    )


if __name__ == "__main__":
    size_in, size_out = 32, 128  # small, TPU-tile-friendly shapes

    key = jax.random.PRNGKey(0)
    weights = kaiming_uniform_init(key, size_in, size_out)

    # Fast path: what the module's forward actually is (identity pass-through).
    direct = my_3d_parameter_forward(weights)
    assert direct is weights

    # Pallas path: materialized copy (tiled, aliased, lane-dense, parallel).
    out = jax.block_until_ready(my_3d_parameter_forward_materialized(weights))

    assert out.shape == (size_in, size_out)
    assert out.dtype == weights.dtype
    assert bool(jnp.array_equal(out, weights))

    print("KERNEL_OK")
</pallas_src>

<mosaic_0001>
module attributes {stable_mosaic.version = 11 : i64} {
  func.func @_copy_kernel(%arg0: i32, %arg1: memref<32x128xf32, #tpu.memory_space<vmem>>, %arg2: memref<32x128xf32, #tpu.memory_space<vmem>>) attributes {dimension_semantics = [#tpu.dimension_semantics<parallel>], iteration_bounds = array<i64: 1>, scalar_prefetch = 0 : i64, scratch_operands = 0 : i64, tpu.core_type = #tpu.core_type<tc>, window_params = [{transform_indices = @transform_0, window_bounds = array<i64: 32, 128>}, {transform_indices = @transform_1, window_bounds = array<i64: 32, 128>}]} {
    %c0 = arith.constant 0 : index
    %c0_0 = arith.constant 0 : index
    %0 = vector.load %arg1[%c0, %c0_0] : memref<32x128xf32, #tpu.memory_space<vmem>>, vector<32x128xf32>
    %c0_1 = arith.constant 0 : index
    %c0_2 = arith.constant 0 : index
    %1 = vector.load %arg2[%c0_1, %c0_2] : memref<32x128xf32, #tpu.memory_space<vmem>>, vector<32x128xf32>
    tpu.vector_store %arg2[%c0_1, %c0_2], %0 {strides = array<i32>} : memref<32x128xf32, #tpu.memory_space<vmem>>, vector<32x128xf32>,
    return
  }
  func.func @transform_0(%arg0: i32) -> (i32, i32) {
    %c0_i32 = arith.constant 0 : i32
    %c0_i32_0 = arith.constant 0 : i32
    return %arg0, %c0_i32 : i32, i32
  }
  func.func @transform_1(%arg0: i32) -> (i32, i32) {
    %c0_i32 = arith.constant 0 : i32
    %c0_i32_0 = arith.constant 0 : i32
    return %arg0, %c0_i32 : i32, i32
  }
}

</mosaic_0001>

<bundles_post_ra>
// kernel: tpu_custom_call.1
= control target key start
LH: loop header
LB: loop body
LE: loop exit
PB: predicated region body
PF: predicated region fallthrough
CT: control target
= control target key end

     0   :  { %6 = vsyncpa [#allocation3], 0  ;;  %s144_s0 = inlined_call_operand.hbm [shape: f32[32,128], index: 0, kind: input, shape index: {}, may-alias: {0,1}]   ;;  %s145_s1 = inlined_call_operand.hbm [shape: f32[32,128], index: 1, kind: output, shape index: {}, may-alias: {0,1}]  }
   0x1   :  { %7 = vsyncpa [#allocation4], 0  ;;  %s100_s6 = smov [#allocation2]   ;;  %s52_s10 = scalar_lea.hbm %s144_s0, 512 }
   0x2   :  { %s13_s7 = sshll.u32 %s100_s6, 4  ;;  %p53_p0 = scmp.ne.s32.totalorder %s144_s0, %s52_s10  ;;  %s14_s7 = int_to_ptr.vmem [resolvable:$true] %s13_s7 }
   0x3   :  { %p56_p1 = scmp.lt.u32.totalorder %s52_s10, %s144_s0 }
   0x5   :  { %p58_p2 = pnand %p56_p1, %p53_p0 }
   0x7   :  { %61 = shalt.err (!%p58_p2)
}
   0x8   :  { %s62_s15 = scalar_lea.vmem %s14_s7, 512  ;;  %p67_p4 = scmp.lt.s32.totalorder %s14_s7, %s14_s7 }
   0x9   :  { %p63_p3 = scmp.ne.s32.totalorder %s14_s7, %s62_s15  ;;  %p68_p5 = scmp.lt.s32.totalorder %s62_s15, %s62_s15 }
   0xb   :  { %p69_p6 = por %p68_p5, %p67_p4 }
   0xd   :  { %p70_p7 = pnand %p69_p6, %p63_p3 }
   0xf   :  { %73 = shalt.err (!%p70_p7)
}
  0x10   :  { %s101_s16 = smov 128   ;;  %s102_s17 = smov 8  }
  0x11   :  { %19 = dma.hbm_to_vmem [thread:$0]  %s144_s0, 512, %s14_s7, [#allocation3], %s101_s16, %s101_s16, %s102_s17  }
  0x12   :  { %96 = dma.done.wait [#allocation3], 512  }
  0x13   :  { %97 = vsyncadd [#allocation3], 4294966784  ;;  %s103_s20 = smov [#allocation5]   ;;  %v23_v0 = vld [vmem:[#allocation2] sm:$0xff]  ;;  %v24_v1 = vld [vmem:[#allocation2 + $0x8] sm:$0xff] }
  0x14   :  { %s36_s21 = sshll.u32 %s103_s20, 4  ;;  %v25_v2 = vld [vmem:[#allocation2 + $0x10] sm:$0xff]  ;;  %27 = vst [vmem:[#allocation5] sm:$0xff] %v23_v0  ;;  %28 = vst [vmem:[#allocation5 + $0x8] sm:$0xff] %v24_v1  ;;  %v26_v3 = vld [vmem:[#allocation2 + $0x18] sm:$0xff]  ;;  %s37_s21 = int_to_ptr.vmem [resolvable:$true] %s36_s21 }
  0x15   :  { %29 = vst [vmem:[#allocation5 + $0x10] sm:$0xff] %v25_v2  ;;  %30 = vst [vmem:[#allocation5 + $0x18] sm:$0xff] %v26_v3  ;;  %s74_s22 = scalar_lea.vmem %s37_s21, 512  ;;  %p79_p9 = scmp.lt.s32.totalorder %s37_s21, %s37_s21 }
  0x16   :  { %p75_p8 = scmp.ne.s32.totalorder %s37_s21, %s74_s22  ;;  %p80_p10 = scmp.lt.s32.totalorder %s74_s22, %s74_s22 }
  0x18   :  { %p81_p11 = por %p80_p10, %p79_p9 }
  0x1a   :  { %p82_p12 = pnand %p81_p11, %p75_p8 }
  0x1c   :  { %85 = shalt.err (!%p82_p12)
}
  0x1d   :  { %s86_s24 = scalar_lea.hbm %s145_s1, 512 }
  0x1e   :  { %p87_p13 = scmp.ne.s32.totalorder %s145_s1, %s86_s24  ;;  %p90_p0 = scmp.lt.u32.totalorder %s86_s24, %s145_s1 }
  0x20   :  { %p92_p1 = pnand %p90_p0, %p87_p13 }
  0x22   :  { %95 = shalt.err (!%p92_p1)
}
  0x23   :  { %42 = dma.vmem_to_hbm [thread:$0]  %s37_s21, 512, %s145_s1, [#allocation4], %s101_s16, %s101_s16, %s102_s17  }
  0x24   :  { %98 = dma.done.wait [#allocation4], 512  }
  0x25   :  { %99 = vsyncadd [#allocation4], 4294966784 }
  0x26   :  { %46 = vsyncpa [#allocation3], 1 }
  0x27   :  { %47 = vsyncpa [#allocation4], 1 }

</bundles_post_ra>
